<compile_context>
chip_gen: v6e
topology: v6e:2x2x1
jax: 0.10.0
libtpu: 0.0.40
codegen_flags: <defaults>
</compile_context>

<pallas_src>
import functools

import jax
import jax.numpy as jnp
from jax import lax
from jax.experimental import pallas as pl
from jax.experimental.pallas import tpu as pltpu

LANE = 128      # f32 lane width
SUBLANE = 8     # f32 sublane count


def _round_up(x, m):
    return (x + m - 1) // m * m


def skipgram_kernel(word_ref, emb_ref, w_ref, b_ref, out_ref):
    # word_ref: (Bp, 1)      int32  word ids (batch on sublanes)
    # emb_ref : (Vp, D)      f32    zero-padded embedding table (full block each tile)
    # w_ref   : (TILE_V, D)  f32    vocab tile of nn.Linear weight (PyTorch layout, NOT transposed)
    # b_ref   : (1, TILE_V)  f32    vocab tile of nn.Linear bias
    # out_ref : (Bp, TILE_V) f32    logits tile (lane-dense: TILE_V == 128)
    ids = word_ref[...]                                   # (Bp, 1)
    B = ids.shape[0]
    Vp = emb_ref.shape[0]

    # Embedding lookup as one-hot matmul: (Bp, Vp) @ (Vp, D) -> (Bp, D).
    # Exact (0/1 weights), MXU-friendly; zero-padded rows of emb are never selected
    # because valid ids are < V <= Vp. (Out-of-range ids yield a zero embedding,
    # i.e. bias-only logits, where PyTorch would raise.)
    vocab_iota = lax.broadcasted_iota(jnp.int32, (B, Vp), 1)
    one_hot = (vocab_iota == ids).astype(emb_ref.dtype)
    embeds = jnp.dot(one_hot, emb_ref[...], preferred_element_type=jnp.float32)

    # Linear: contract D of embeds with D of the (TILE_V, D) weight tile — no transpose.
    logits = lax.dot_general(
        embeds, w_ref[...],
        dimension_numbers=(((1,), (1,)), ((), ())),
        preferred_element_type=jnp.float32,
    )                                                     # (Bp, TILE_V)
    out_ref[...] = (logits + b_ref[...]).astype(out_ref.dtype)


def prepare_params(emb_table, lin_w, lin_b):
    """One-time (hoisted out of the hot path) parameter prep: zero-pad vocab to 128 lanes."""
    V, D = emb_table.shape
    Vp = _round_up(V, LANE)
    pad = Vp - V
    emb_p = jnp.pad(emb_table, ((0, pad), (0, 0)))        # (Vp, D)
    w_p = jnp.pad(lin_w, ((0, pad), (0, 0)))              # (Vp, D)  PyTorch layout kept
    b_p = jnp.pad(lin_b, (0, pad)).reshape(1, Vp)         # (1, Vp)
    return emb_p, w_p, b_p


@functools.partial(jax.jit, static_argnames=("vocab_size", "tile_v"))
def skipgram_forward(word, emb_p, w_p, b_p, *, vocab_size, tile_v=LANE):
    """word: (B,) int32; emb_p/w_p: (Vp, D); b_p: (1, Vp)  ->  (B, vocab_size) f32 logits."""
    B = word.shape[0]
    Vp, D = emb_p.shape
    assert Vp % tile_v == 0

    Bp = _round_up(B, SUBLANE)                            # keep batch sublane-aligned
    word2d = word.reshape(B, 1).astype(jnp.int32)
    if Bp != B:
        word2d = jnp.pad(word2d, ((0, Bp - B), (0, 0)))

    grid = (Vp // tile_v,)                                # vocab-tiled, megacore-parallel
    out_p = pl.pallas_call(
        skipgram_kernel,
        out_shape=jax.ShapeDtypeStruct((Bp, Vp), jnp.float32),
        grid_spec=pltpu.PrefetchScalarGridSpec(
            num_scalar_prefetch=0,
            grid=grid,
            in_specs=[
                pl.BlockSpec((Bp, 1), lambda j: (0, 0)),        # word ids (full)
                pl.BlockSpec((Vp, D), lambda j: (0, 0)),        # embedding table (full)
                pl.BlockSpec((tile_v, D), lambda j: (j, 0)),    # Linear weight, vocab tile
                pl.BlockSpec((1, tile_v), lambda j: (0, j)),    # bias, vocab tile
            ],
            out_specs=pl.BlockSpec((Bp, tile_v), lambda j: (0, j)),
        ),
        compiler_params=pltpu.CompilerParams(
            dimension_semantics=("parallel",),
        ),
    )(word2d, emb_p, w_p, b_p)

    return out_p[:B, :vocab_size]


if __name__ == "__main__":
    # Small shapes consistent with the module: vocab_size=64, embedding_dim=32, batch=8.
    vocab_size = 64
    embedding_dim = 32
    batch = 8

    key = jax.random.PRNGKey(0)
    k_emb, k_w, k_b, k_idx = jax.random.split(key, 4)

    # Deterministic parameter init (shapes match nn.Embedding / nn.Linear).
    emb_table = jax.random.normal(k_emb, (vocab_size, embedding_dim), dtype=jnp.float32)
    bound = 1.0 / (embedding_dim ** 0.5)
    lin_w = jax.random.uniform(k_w, (vocab_size, embedding_dim),
                               minval=-bound, maxval=bound, dtype=jnp.float32)
    lin_b = jax.random.uniform(k_b, (vocab_size,),
                               minval=-bound, maxval=bound, dtype=jnp.float32)

    word = jax.random.randint(k_idx, (batch,), 0, vocab_size, dtype=jnp.int32)

    # One-time parameter prep (cached across forward calls — not per-call work).
    emb_p, w_p, b_p = prepare_params(emb_table, lin_w, lin_b)

    logits = skipgram_forward(word, emb_p, w_p, b_p, vocab_size=vocab_size)
    logits = jax.block_until_ready(logits)

    # Reference check in plain JAX (embedding gather + linear).
    ref = emb_table[word] @ lin_w.T + lin_b
    assert logits.shape == (batch, vocab_size)
    assert jnp.allclose(logits, ref, atol=1e-5, rtol=1e-5)

    print("KERNEL_OK")
</pallas_src>

<mosaic_0001>
module attributes {stable_mosaic.version = 11 : i64} {
  func.func @skipgram_kernel(%arg0: i32, %arg1: memref<8x1xi32, #tpu.memory_space<vmem>>, %arg2: memref<128x32xf32, #tpu.memory_space<vmem>>, %arg3: memref<128x32xf32, #tpu.memory_space<vmem>>, %arg4: memref<1x128xf32, #tpu.memory_space<vmem>>, %arg5: memref<8x128xf32, #tpu.memory_space<vmem>>) attributes {dimension_semantics = [#tpu.dimension_semantics<parallel>], iteration_bounds = array<i64: 1>, scalar_prefetch = 0 : i64, scratch_operands = 0 : i64, tpu.core_type = #tpu.core_type<tc>, window_params = [{pipeline_mode = #tpu.pipeline_mode<synchronous>, transform_indices = @transform_0, window_bounds = array<i64: 8, 1>}, {pipeline_mode = #tpu.pipeline_mode<synchronous>, transform_indices = @transform_1, window_bounds = array<i64: 128, 32>}, {transform_indices = @transform_2, window_bounds = array<i64: 128, 32>}, {transform_indices = @transform_3, window_bounds = array<i64: 1, 128>}, {transform_indices = @transform_4, window_bounds = array<i64: 8, 128>}]} {
    %c0 = arith.constant 0 : index
    %c0_0 = arith.constant 0 : index
    %0 = vector.load %arg1[%c0, %c0_0] : memref<8x1xi32, #tpu.memory_space<vmem>>, vector<8x1xi32>
    %1 = tpu.iota {dimensions = array<i32: 1>} : vector<8x128xi32>
    %2 = vector.broadcast %0 : vector<8x1xi32> to vector<8x128xi32>
    %3 = arith.cmpi eq, %1, %2 : vector<8x128xi32>
    %4 = arith.extui %3 : vector<8x128xi1> to vector<8x128xi32>
    %5 = arith.sitofp %4 : vector<8x128xi32> to vector<8x128xf32>
    %c0_1 = arith.constant 0 : index
    %c0_2 = arith.constant 0 : index
    %6 = vector.load %arg2[%c0_1, %c0_2] : memref<128x32xf32, #tpu.memory_space<vmem>>, vector<128x32xf32>
    %cst = arith.constant dense<0.000000e+00> : vector<8x32xf32>
    %7 = tpu.matmul %5, %6, %cst {dimension_numbers = #tpu.dot_dimension_numbers<[1], [0], [0], [1], [0, 0, 1, 1], [], []>} : vector<8x128xf32>, vector<128x32xf32>, vector<8x32xf32> -> vector<8x32xf32>
    %c0_3 = arith.constant 0 : index
    %c0_4 = arith.constant 0 : index
    %8 = vector.load %arg3[%c0_3, %c0_4] : memref<128x32xf32, #tpu.memory_space<vmem>>, vector<128x32xf32>
    %cst_5 = arith.constant dense<0.000000e+00> : vector<8x128xf32>
    %9 = tpu.matmul %7, %8, %cst_5 {dimension_numbers = #tpu.dot_dimension_numbers<[1], [1], [0], [0], [0, 0, 1, 0], [], []>} : vector<8x32xf32>, vector<128x32xf32>, vector<8x128xf32> -> vector<8x128xf32>
    %c0_6 = arith.constant 0 : index
    %c0_7 = arith.constant 0 : index
    %10 = vector.load %arg4[%c0_6, %c0_7] : memref<1x128xf32, #tpu.memory_space<vmem>>, vector<1x128xf32>
    %11 = vector.broadcast %10 : vector<1x128xf32> to vector<8x128xf32>
    %12 = arith.addf %9, %11 : vector<8x128xf32>
    %c0_8 = arith.constant 0 : index
    %c0_9 = arith.constant 0 : index
    %13 = vector.load %arg5[%c0_8, %c0_9] : memref<8x128xf32, #tpu.memory_space<vmem>>, vector<8x128xf32>
    tpu.vector_store %arg5[%c0_8, %c0_9], %12 {strides = array<i32>} : memref<8x128xf32, #tpu.memory_space<vmem>>, vector<8x128xf32>,
    return
  }
  func.func @transform_0(%arg0: i32) -> (i32, i32) {
    %c0_i32 = arith.constant 0 : i32
    %c0_i32_0 = arith.constant 0 : i32
    %c0_i32_1 = arith.constant 0 : i32
    return %c0_i32, %c0_i32_0 : i32, i32
  }
  func.func @transform_1(%arg0: i32) -> (i32, i32) {
    %c0_i32 = arith.constant 0 : i32
    %c0_i32_0 = arith.constant 0 : i32
    %c0_i32_1 = arith.constant 0 : i32
    return %c0_i32, %c0_i32_0 : i32, i32
  }
  func.func @transform_2(%arg0: i32) -> (i32, i32) {
    %c0_i32 = arith.constant 0 : i32
    %c0_i32_0 = arith.constant 0 : i32
    return %arg0, %c0_i32 : i32, i32
  }
  func.func @transform_3(%arg0: i32) -> (i32, i32) {
    %c0_i32 = arith.constant 0 : i32
    %c0_i32_0 = arith.constant 0 : i32
    return %c0_i32, %arg0 : i32, i32
  }
  func.func @transform_4(%arg0: i32) -> (i32, i32) {
    %c0_i32 = arith.constant 0 : i32
    %c0_i32_0 = arith.constant 0 : i32
    return %c0_i32, %arg0 : i32, i32
  }
}

</mosaic_0001>

<bundles_post_ra>
// kernel: skipgram_forward.1
= control target key start
LH: loop header
LB: loop body
LE: loop exit
PB: predicated region body
PF: predicated region fallthrough
CT: control target
= control target key end

     0   :  { %v425_v2 = vmov 0   ;;  %v426_v3 = vmov 0.0   ;;  %vm427_vm0 = vmmov 0   ;;  %vm136_vm1 = vcmask 261120   ;;  %s611_s0 = inlined_call_operand.vmem [shape: s32[8,1], index: 0, kind: input, shape index: {}]   ;;  %s612_s1 = inlined_call_operand.vmem [shape: f32[128,32], index: 1, kind: input, shape index: {}]   ;;  %s613_s2 = inlined_call_operand.vmem [shape: f32[128,32], index: 2, kind: input, shape index: {}]   ;;  %s614_s3 = inlined_call_operand.vmem [shape: f32[1,128], index: 3, kind: input, shape index: {}]   ;;  %s615_s4 = inlined_call_operand.hbm [shape: f32[8,128], index: 4, kind: output, shape index: {}]  }
   0x1   :  { %v18_v0 = vld [vmem:[%s611_s0] sm:$0xff]  ;;  %v42_v1 = vld [vmem:[%s612_s1 + $0x78] sm:$0xff]  ;;  %402 = vset.pattern.permute.xlu0 %v425_v2  ;;  %327 = vmatprep.subr.mxu0 %v426_v3  ;;  %v41_v4 = vld [vmem:[%s612_s1 + $0x70] sm:$0xff] }
   0x2   :  { %22 = vperm.xlu0 %402, %v18_v0   ;;  %328 = vmatpush3.msra.mxu0 %v42_v1  ;;  %v40_v5 = vld [vmem:[%s612_s1 + $0x68] sm:$0xff]  ;;  %v39_v6 = vld [vmem:[%s612_s1 + $0x60] sm:$0xff]  ;;  %v128_v7 = vld [vmem:[%s613_s2 + $0x78] sm:$0xff] }
   0x3   :  { %329 = vmatprep.subr.mxu0 %v426_v3  ;;  %359 = vmatprep.mubr.msk.f32.mxu0 %vm427_vm0, %v426_v3  ;;  %v38_v8 = vld [vmem:[%s612_s1 + $0x58] sm:$0xff]  ;;  %v127_v9 = vld [vmem:[%s613_s2 + $0x70] sm:$0xff]  ;;  %v36_v11 = vld [vmem:[%s612_s1 + $0x48] sm:$0xff] }
   0x4   :  { %330 = vmatpush3.msra.mxu0 %v41_v4  ;;  %362 = vmatprep.subr.mxu1 %v426_v3  ;;  %v37_v10 = vld [vmem:[%s612_s1 + $0x50] sm:$0xff]  ;;  %v126_v12 = vld [vmem:[%s613_s2 + $0x68] sm:$0xff] }
   0x5   :  { %331 = vmatprep.subr.mxu0 %v426_v3  ;;  %394 = vmatprep.mubr.msk.f32.mxu1 %vm427_vm0, %v426_v3 }
   0x6   :  { %332 = vmatpush3.msra.mxu0 %v40_v5  ;;  %363 = vmatpush3.xpose.msk.msra.mxu1 %vm136_vm1, %v128_v7 }
   0x7   :  { %333 = vmatprep.subr.mxu0 %v426_v3  ;;  %364 = vmatprep.subr.mxu1 %v426_v3 }
   0x8   :  { %334 = vmatpush3.msra.mxu0 %v39_v6 }
   0x9   :  { %335 = vmatprep.subr.mxu0 %v426_v3 }
   0xa   :  { %336 = vmatpush3.msra.mxu0 %v38_v8  ;;  %365 = vmatpush3.xpose.msk.msra.mxu1 %vm136_vm1, %v127_v9 }
   0xb   :  { %337 = vmatprep.subr.mxu0 %v426_v3  ;;  %366 = vmatprep.subr.mxu1 %v426_v3 }
   0xc   :  { %9 = vsyncpa [#allocation3], 0  ;;  %338 = vmatpush3.msra.mxu0 %v37_v10  ;;  %v35_v13 = vld [vmem:[%s612_s1 + $0x40] sm:$0xff]  ;;  %v34_v14 = vld [vmem:[%s612_s1 + $0x38] sm:$0xff]  ;;  %v19_v35 = vlaneseq  ;;  %v428_v38 = vmov 1.0   ;;  %s429_s27 = smov [#allocation2]  }
   0xd   :  { %339 = vmatprep.subr.mxu0 %v426_v3  ;;  %v125_v15 = vld [vmem:[%s613_s2 + $0x60] sm:$0xff]  ;;  %v33_v16 = vld [vmem:[%s612_s1 + $0x30] sm:$0xff]  ;;  %v32_v17 = vld [vmem:[%s612_s1 + $0x28] sm:$0xff]  ;;  %s265_s28 = sshll.u32 %s429_s27, 4  ;;  %s266_s28 = int_to_ptr.vmem [resolvable:$true] %s265_s28 }
   0xe   :  { %340 = vmatpush3.msra.mxu0 %v36_v11  ;;  %367 = vmatpush3.xpose.msk.msra.mxu1 %vm136_vm1, %v126_v12  ;;  %v124_v18 = vld [vmem:[%s613_s2 + $0x58] sm:$0xff]  ;;  %v31_v19 = vld [vmem:[%s612_s1 + $0x20] sm:$0xff]  ;;  %v123_v21 = vld [vmem:[%s613_s2 + $0x50] sm:$0xff]  ;;  %v20_v36 = vand.u32 127, %v19_v35  ;;  %p408_p1 = scmp.lt.s32.totalorder %s266_s28, %s266_s28 }
   0xf   :  { %341 = vmatprep.subr.mxu0 %v426_v3  ;;  %368 = vmatprep.subr.mxu1 %v426_v3  ;;  %v30_v20 = vld [vmem:[%s612_s1 + $0x18] sm:$0xff]  ;;  %v29_v22 = vld [vmem:[%s612_s1 + $0x10] sm:$0xff]  ;;  %v28_v23 = vld [vmem:[%s612_s1 + $0x8] sm:$0xff] }
  0x10   :  { %342 = vmatpush3.msra.mxu0 %v35_v13  ;;  %v122_v24 = vld [vmem:[%s613_s2 + $0x48] sm:$0xff]  ;;  %v27_v25 = vld [vmem:[%s612_s1] sm:$0xff]  ;;  %v120_v27 = vld [vmem:[%s613_s2 + $0x38] sm:$0xff] }
  0x11   :  { %343 = vmatprep.subr.mxu0 %v426_v3  ;;  %v121_v26 = vld [vmem:[%s613_s2 + $0x40] sm:$0xff]  ;;  %v119_v28 = vld [vmem:[%s613_s2 + $0x30] sm:$0xff]  ;;  %v118_v29 = vld [vmem:[%s613_s2 + $0x28] sm:$0xff] }
  0x12   :  { %344 = vmatpush3.msra.mxu0 %v34_v14  ;;  %369 = vmatpush3.xpose.msk.msra.mxu1 %vm136_vm1, %v125_v15  ;;  %v117_v30 = vld [vmem:[%s613_s2 + $0x20] sm:$0xff]  ;;  %v116_v31 = vld [vmem:[%s613_s2 + $0x18] sm:$0xff]  ;;  %v115_v32 = vld [vmem:[%s613_s2 + $0x10] sm:$0xff] }
  0x13   :  { %345 = vmatprep.subr.mxu0 %v426_v3  ;;  %370 = vmatprep.subr.mxu1 %v426_v3  ;;  %v114_v33 = vld [vmem:[%s613_s2 + $0x8] sm:$0xff]  ;;  %v113_v34 = vld [vmem:[%s613_s2] sm:$0xff]  ;;  %s403_s2 = scalar_lea.vmem %s266_s28, 128 }
  0x14   :  { %346 = vmatpush3.msra.mxu0 %v33_v16  ;;  %v275_v41 = vld [vmem:[%s614_s3] ss:$0 sm:$0xff]  ;;  %p404_p0 = scmp.ne.s32.totalorder %s266_s28, %s403_s2  ;;  %p409_p2 = scmp.lt.s32.totalorder %s403_s2, %s403_s2 }
  0x15   :  { %347 = vmatprep.subr.mxu0 %v426_v3 }
  0x16   :  { %348 = vmatpush3.msra.mxu0 %v32_v17  ;;  %371 = vmatpush3.xpose.msk.msra.mxu1 %vm136_vm1, %v124_v18  ;;  %p410_p3 = por %p409_p2, %p408_p1 }
  0x17   :  { %349 = vmatprep.subr.mxu0 %v426_v3  ;;  %372 = vmatprep.subr.mxu1 %v426_v3 }
  0x18   :  { %350 = vmatpush3.msra.mxu0 %v31_v19  ;;  %p411_p4 = pnand %p410_p3, %p404_p0 }
  0x19   :  { %351 = vmatprep.subr.mxu0 %v426_v3 }
  0x1a   :  { %352 = vmatpush3.msra.mxu0 %v30_v20  ;;  %373 = vmatpush3.xpose.msk.msra.mxu1 %vm136_vm1, %v123_v21 }
  0x1b   :  { %353 = vmatprep.subr.mxu0 %v426_v3  ;;  %374 = vmatprep.subr.mxu1 %v426_v3 }
  0x1c   :  { %354 = vmatpush3.msra.mxu0 %v29_v22 }
  0x1d   :  { %355 = vmatprep.subr.mxu0 %v426_v3 }
  0x1e   :  { %356 = vmatpush3.msra.mxu0 %v28_v23  ;;  %375 = vmatpush3.xpose.msk.msra.mxu1 %vm136_vm1, %v122_v24 }
  0x1f   :  { %357 = vmatprep.subr.mxu0 %v426_v3  ;;  %376 = vmatprep.subr.mxu1 %v426_v3 }
  0x20   :  { %358 = vmatpush3.msra.mxu0 %v27_v25 }
  0x22   :  { %377 = vmatpush3.xpose.msk.msra.mxu1 %vm136_vm1, %v121_v26 }
  0x23   :  { %378 = vmatprep.subr.mxu1 %v426_v3 }
  0x26   :  { %379 = vmatpush3.xpose.msk.msra.mxu1 %vm136_vm1, %v120_v27 }
  0x27   :  { %380 = vmatprep.subr.mxu1 %v426_v3 }
  0x2a   :  { %381 = vmatpush3.xpose.msk.msra.mxu1 %vm136_vm1, %v119_v28 }
  0x2b   :  { %382 = vmatprep.subr.mxu1 %v426_v3 }
  0x2e   :  { %383 = vmatpush3.xpose.msk.msra.mxu1 %vm136_vm1, %v118_v29 }
  0x2f   :  { %384 = vmatprep.subr.mxu1 %v426_v3 }
  0x32   :  { %385 = vmatpush3.xpose.msk.msra.mxu1 %vm136_vm1, %v117_v30 }
  0x33   :  { %386 = vmatprep.subr.mxu1 %v426_v3 }
  0x36   :  { %387 = vmatpush3.xpose.msk.msra.mxu1 %vm136_vm1, %v116_v31 }
  0x37   :  { %388 = vmatprep.subr.mxu1 %v426_v3 }
  0x3a   :  { %389 = vmatpush3.xpose.msk.msra.mxu1 %vm136_vm1, %v115_v32 }
  0x3b   :  { %390 = vmatprep.subr.mxu1 %v426_v3 }
  0x3e   :  { %391 = vmatpush3.xpose.msk.msra.mxu1 %vm136_vm1, %v114_v33 }
  0x3f   :  { %392 = vmatprep.subr.mxu1 %v426_v3 }
  0x42   :  { %393 = vmatpush3.xpose.msk.msra.mxu1 %vm136_vm1, %v113_v34 }
  0x7d   :  { %v23_v37 = vpop.permute.xlu0 %22 }
  0x7e   :  { %vm24_vm2 = vcmp.eq.s32.totalorder %v20_v36, %v23_v37 }
  0x7f   :  { %360 = vmatmul.mubr.msk.f32.vlgmr.msra.gmra.mxu0 %vm24_vm2, %v428_v38 }
 0x13f   :  { %v109_v39 = vpop.f32.mrf.mxu0 }
 0x140   :  { %395 = vmatmul.mubr.msk.f32.vlgmr.msra.gmra.mxu1 %vm136_vm1, %v109_v39 }
 0x141   :  { %v361_v40 = vpop.f32.mrf.mxu0 }
 0x200   :  { %v254_v42 = vpop.f32.mrf.mxu1 }
 0x201   :  { %v255_v43 = vadd.f32 %v275_v41, %v254_v42 }
 0x202   :  { %v396_v44 = vpop.f32.mrf.mxu1 }
 0x203   :  { %258 = vst [vmem:[#allocation2] sm:$0xff] %v255_v43 }
 0x204   :  { %414 = shalt.err (!%p411_p4)
}
 0x205   :  { %268 = dma.vmem_to_hbm [thread:$0]  %s266_s28, 128, %s615_s4, [#allocation3]  }
 0x206   :  { %423 = dma.done.wait [#allocation3], 128  }
 0x207   :  { %424 = vsyncadd [#allocation3], 4294967168 }
 0x208   :  { %272 = vsyncpa [#allocation3], 1 }

</bundles_post_ra>
